<compile_context>
chip_gen: v7x
topology: tpu7x:2x2x1
jax: 0.10.0
libtpu: 0.0.40
codegen_flags: <defaults>
</compile_context>

<pallas_src>
import functools

import jax
import jax.numpy as jnp
from jax import lax
from jax.experimental import pallas as pl
from jax.experimental.pallas import tpu as pltpu


def _round_up(n, m):
    return ((n + m - 1) // m) * m


def _vmem_budget_cap():
    """Generation-aware VMEM cap (~80% of physical, with headroom)."""
    cap = 64 << 20  # conservative fallback (v7x per-TC VMEM)
    try:
        info = pltpu.get_tpu_info()
        cap = int(getattr(info, "vmem_capacity_bytes", cap))
    except Exception:
        pass
    return int(min(0.8 * cap, cap - (8 << 20)))


# ---------------------------------------------------------------------------
# Kernel: per-batch-tile  sim = x @ fc (MXU, f32 acc), post-matmul column
# scale (hoisted F.normalize) + additive pad-mask bias, row softmax in f32.
# ---------------------------------------------------------------------------
def _cproxy_kernel(x_ref, fc_ref, inv_ref, bias_ref, out_ref):
    # (block_b, dim_p) @ (dim_p, cn_p) -> f32 on the MXU.
    sim = jnp.dot(x_ref[...], fc_ref[...], preferred_element_type=jnp.float32)
    # Column scale == matmul against L2-normalized columns; additive bias
    # (-1e30 on zero-padded proxy columns) keeps the softmax exact.
    sim = sim * inv_ref[...] + bias_ref[...]
    m = jnp.max(sim, axis=1, keepdims=True)
    e = jnp.exp(sim - m)                                    # EUP exp, f32
    denom = jnp.sum(e, axis=1, keepdims=True)
    r = pl.reciprocal(denom, approx=True)                   # EUP approx
    r = r * (2.0 - denom * r)                               # 1 NR step -> ~exact
    out_ref[...] = (e * r).astype(out_ref.dtype)


@functools.partial(jax.jit, static_argnames=("block_b", "operand_dtype", "out_dtype"))
def cproxy_forward(x, fc, *, block_b=256, operand_dtype=jnp.bfloat16,
                   out_dtype=jnp.bfloat16):
    B, dim = x.shape
    dim_f, cN = fc.shape
    assert dim == dim_f

    # Lane / sublane / MXU alignment.
    dim_p = _round_up(dim, 128)                 # contraction axis, lane-dense x
    cn_p = _round_up(cN, 128)                   # output axis, lane-dense stores

    opd_bytes = jnp.dtype(operand_dtype).itemsize
    out_bytes = jnp.dtype(out_dtype).itemsize

    def vmem_needed(bb):
        return (2 * bb * dim_p * opd_bytes      # double-buffered x tile
                + 2 * bb * cn_p * out_bytes     # double-buffered out tile
                + dim_p * cn_p * opd_bytes      # fc resident (single-buffered)
                + 2 * cn_p * 4                  # inv + bias (single-buffered)
                + 2 * bb * cn_p * 4             # f32 softmax intermediates (sim/e)
                + (2 << 20))                    # headroom

    # Batch tile: multiple of 16 (bf16 sublane packing), >= 2 tiles when the
    # batch allows (v7x megacore), shrunk if the VMEM budget would be blown,
    # then spread evenly over the resulting tile count to minimize padding.
    block_b = _round_up(max(16, min(block_b, _round_up(B, 16))), 16)
    if B > 16 and _round_up(B, block_b) // block_b < 2:
        block_b = max(16, _round_up(B, 32) // 2)
    cap = _vmem_budget_cap()
    while vmem_needed(block_b) > cap and block_b > 16:
        block_b = _round_up(max(16, block_b // 2), 16)
    n_tiles = -(-B // block_b)
    block_b = _round_up(-(-B // n_tiles), 16)
    b_p = n_tiles * block_b
    vmem_limit = int(min(max(vmem_needed(block_b), 32 << 20), cap))

    # --- inv-norm + pad-mask bias: tiny XLA reductions on the unpadded fc ----
    fc32 = fc.astype(jnp.float32)
    sumsq = jnp.sum(fc32 * fc32, axis=0, keepdims=True)            # (1, cN)
    inv = lax.rsqrt(jnp.maximum(sumsq, 1e-24))                     # == 1/max(||.||,1e-12)
    if cn_p != cN:
        inv = jnp.pad(inv, ((0, 0), (0, cn_p - cN)))
    bias = jnp.where(jnp.arange(cn_p) < cN, 0.0, -1e30)
    bias = bias.astype(jnp.float32).reshape(1, cn_p)

    # --- operand pad / cast only when actually required -----------------------
    x_p = x if x.dtype == operand_dtype else x.astype(operand_dtype)
    if b_p != B or dim_p != dim:
        x_p = jnp.pad(x_p, ((0, b_p - B), (0, dim_p - dim)))
    fc_p = fc if fc.dtype == operand_dtype else fc.astype(operand_dtype)
    if dim_p != dim or cn_p != cN:
        fc_p = jnp.pad(fc_p, ((0, dim_p - dim), (0, cn_p - cN)))

    # --- batched matmul + softmax, pipelined over batch tiles -----------------
    out_p = pl.pallas_call(
        _cproxy_kernel,
        out_shape=jax.ShapeDtypeStruct((b_p, cn_p), out_dtype),
        grid=(b_p // block_b,),
        in_specs=[
            pl.BlockSpec((block_b, dim_p), lambda i: (i, 0)),       # x streams per tile
            pl.BlockSpec((dim_p, cn_p), lambda i: (0, 0),           # fc resident
                         pipeline_mode=pl.Buffered(1)),
            pl.BlockSpec((1, cn_p), lambda i: (0, 0),               # inv resident
                         pipeline_mode=pl.Buffered(1)),
            pl.BlockSpec((1, cn_p), lambda i: (0, 0),               # bias resident
                         pipeline_mode=pl.Buffered(1)),
        ],
        out_specs=pl.BlockSpec((block_b, cn_p), lambda i: (i, 0)),
        compiler_params=pltpu.CompilerParams(
            dimension_semantics=("parallel",),   # megacore-shard batch tiles (v7x)
            vmem_limit_bytes=vmem_limit,
        ),
    )(x_p, fc_p, inv, bias)

    if b_p != B or cn_p != cN:
        out_p = out_p[:B, :cN]
    return out_p


def init_fc(key, dim, cN):
    # torch.nn.init.xavier_normal_: std = sqrt(2 / (fan_in + fan_out)), gain=1.
    std = jnp.sqrt(2.0 / (dim + cN))
    return std * jax.random.normal(key, (dim, cN), dtype=jnp.float32)


def _reference(x, fc):
    # Pure-f32 reference mirroring the PyTorch module.
    fc32 = fc.astype(jnp.float32)
    inv = lax.rsqrt(jnp.maximum(jnp.sum(fc32 * fc32, axis=0, keepdims=True), 1e-24))
    sim = jnp.dot(x.astype(jnp.float32), fc32,
                  preferred_element_type=jnp.float32) * inv
    return jax.nn.softmax(sim, axis=1)


if __name__ == "__main__":
    key = jax.random.PRNGKey(0)
    k_x, k_fc, k_x2 = jax.random.split(key, 3)

    # Small shapes consistent with the module: x: (B, dim), fc: (dim, cN).
    B, dim, cN = 8, 32, 16
    x = jax.random.normal(k_x, (B, dim), dtype=jnp.float32)
    fc = init_fc(k_fc, dim, cN)
    ref = _reference(x, fc)

    # Default path: bf16 operands, bf16 output.
    out = cproxy_forward(x, fc)
    jax.block_until_ready(out)
    assert out.shape == (B, cN)
    out_f32 = out.astype(jnp.float32)
    assert bool(jnp.max(jnp.abs(out_f32 - ref)) < 3e-2)
    assert bool(jnp.all(jnp.abs(jnp.sum(out_f32, axis=1) - 1.0) < 2e-2))

    # f32-operand / f32-output path: tight check against the f32 reference.
    out32 = cproxy_forward(x, fc, operand_dtype=jnp.float32, out_dtype=jnp.float32)
    jax.block_until_ready(out32)
    assert out32.shape == (B, cN)
    assert bool(jnp.max(jnp.abs(out32 - ref)) < 5e-3)
    assert bool(jnp.all(jnp.abs(jnp.sum(out32, axis=1) - 1.0) < 1e-3))

    # Exercise batch tiling + padding (grid > 1, non-multiple batch).
    B2 = 300
    x2 = jax.random.normal(k_x2, (B2, dim), dtype=jnp.float32)
    out2 = cproxy_forward(x2, fc, block_b=128)
    jax.block_until_ready(out2)
    assert out2.shape == (B2, cN)
    ref2 = _reference(x2, fc)
    out2_f32 = out2.astype(jnp.float32)
    assert bool(jnp.max(jnp.abs(out2_f32 - ref2)) < 3e-2)
    assert bool(jnp.all(jnp.abs(jnp.sum(out2_f32, axis=1) - 1.0) < 2e-2))

    print("KERNEL_OK")
</pallas_src>

<mosaic_0001>
module attributes {stable_mosaic.version = 11 : i64} {
  func.func @_cproxy_kernel(%arg0: i32, %arg1: memref<16x128xbf16, #tpu.memory_space<vmem>>, %arg2: memref<128x128xbf16, #tpu.memory_space<vmem>>, %arg3: memref<1x128xf32, #tpu.memory_space<vmem>>, %arg4: memref<1x128xf32, #tpu.memory_space<vmem>>, %arg5: memref<16x128xbf16, #tpu.memory_space<vmem>>) attributes {dimension_semantics = [#tpu.dimension_semantics<parallel>], iteration_bounds = array<i64: 1>, scalar_prefetch = 0 : i64, scratch_operands = 0 : i64, tpu.core_type = #tpu.core_type<tc>, window_params = [{transform_indices = @transform_0, window_bounds = array<i64: 16, 128>}, {pipeline_mode = #tpu.pipeline_mode<synchronous>, transform_indices = @transform_1, window_bounds = array<i64: 128, 128>}, {pipeline_mode = #tpu.pipeline_mode<synchronous>, transform_indices = @transform_2, window_bounds = array<i64: 1, 128>}, {pipeline_mode = #tpu.pipeline_mode<synchronous>, transform_indices = @transform_3, window_bounds = array<i64: 1, 128>}, {transform_indices = @transform_4, window_bounds = array<i64: 16, 128>}]} {
    %c0 = arith.constant 0 : index
    %c0_0 = arith.constant 0 : index
    %0 = vector.load %arg1[%c0, %c0_0] : memref<16x128xbf16, #tpu.memory_space<vmem>>, vector<16x128xbf16>
    %c0_1 = arith.constant 0 : index
    %c0_2 = arith.constant 0 : index
    %1 = vector.load %arg2[%c0_1, %c0_2] : memref<128x128xbf16, #tpu.memory_space<vmem>>, vector<128x128xbf16>
    %cst = arith.constant dense<0.000000e+00> : vector<16x128xf32>
    %2 = tpu.matmul %0, %1, %cst {dimension_numbers = #tpu.dot_dimension_numbers<[1], [0], [0], [1], [0, 0, 1, 1], [], []>} : vector<16x128xbf16>, vector<128x128xbf16>, vector<16x128xf32> -> vector<16x128xf32>
    %c0_3 = arith.constant 0 : index
    %c0_4 = arith.constant 0 : index
    %3 = vector.load %arg3[%c0_3, %c0_4] : memref<1x128xf32, #tpu.memory_space<vmem>>, vector<1x128xf32>
    %4 = vector.broadcast %3 : vector<1x128xf32> to vector<16x128xf32>
    %5 = arith.mulf %2, %4 : vector<16x128xf32>
    %c0_5 = arith.constant 0 : index
    %c0_6 = arith.constant 0 : index
    %6 = vector.load %arg4[%c0_5, %c0_6] : memref<1x128xf32, #tpu.memory_space<vmem>>, vector<1x128xf32>
    %7 = vector.broadcast %6 : vector<1x128xf32> to vector<16x128xf32>
    %8 = arith.addf %5, %7 : vector<16x128xf32>
    %cst_7 = arith.constant dense<0xFF800000> : vector<16xf32>
    %9 = vector.multi_reduction <maximumf>, %8, %cst_7 [1] : vector<16x128xf32> to vector<16xf32>
    %10 = vector.shape_cast %9 : vector<16xf32> to vector<16x1xf32>
    %11 = vector.broadcast %10 : vector<16x1xf32> to vector<16x128xf32>
    %12 = arith.subf %8, %11 : vector<16x128xf32>
    %13 = math.exp %12 : vector<16x128xf32>
    %cst_8 = arith.constant dense<0.000000e+00> : vector<16xf32>
    %14 = vector.multi_reduction <add>, %13, %cst_8 [1] : vector<16x128xf32> to vector<16xf32>
    %15 = vector.shape_cast %14 : vector<16xf32> to vector<16x1xf32>
    %16 = tpu.reciprocal %15 {approx = true} : vector<16x1xf32> -> vector<16x1xf32>
    %17 = arith.mulf %15, %16 : vector<16x1xf32>
    %cst_9 = arith.constant 2.000000e+00 : f32
    %18 = vector.broadcast %cst_9 : f32 to vector<16x1xf32>
    %19 = arith.subf %18, %17 : vector<16x1xf32>
    %20 = arith.mulf %16, %19 : vector<16x1xf32>
    %21 = vector.broadcast %20 : vector<16x1xf32> to vector<16x128xf32>
    %22 = arith.mulf %13, %21 : vector<16x128xf32>
    %23 = arith.truncf %22 : vector<16x128xf32> to vector<16x128xbf16>
    %c0_10 = arith.constant 0 : index
    %c0_11 = arith.constant 0 : index
    %24 = vector.load %arg5[%c0_10, %c0_11] : memref<16x128xbf16, #tpu.memory_space<vmem>>, vector<16x128xbf16>
    tpu.vector_store %arg5[%c0_10, %c0_11], %23 {strides = array<i32>} : memref<16x128xbf16, #tpu.memory_space<vmem>>, vector<16x128xbf16>,
    return
  }
  func.func @transform_0(%arg0: i32) -> (i32, i32) {
    %c0_i32 = arith.constant 0 : i32
    %c0_i32_0 = arith.constant 0 : i32
    return %arg0, %c0_i32 : i32, i32
  }
  func.func @transform_1(%arg0: i32) -> (i32, i32) {
    %c0_i32 = arith.constant 0 : i32
    %c0_i32_0 = arith.constant 0 : i32
    %c0_i32_1 = arith.constant 0 : i32
    return %c0_i32, %c0_i32_0 : i32, i32
  }
  func.func @transform_2(%arg0: i32) -> (i32, i32) {
    %c0_i32 = arith.constant 0 : i32
    %c0_i32_0 = arith.constant 0 : i32
    %c0_i32_1 = arith.constant 0 : i32
    return %c0_i32, %c0_i32_0 : i32, i32
  }
  func.func @transform_3(%arg0: i32) -> (i32, i32) {
    %c0_i32 = arith.constant 0 : i32
    %c0_i32_0 = arith.constant 0 : i32
    %c0_i32_1 = arith.constant 0 : i32
    return %c0_i32, %c0_i32_0 : i32, i32
  }
  func.func @transform_4(%arg0: i32) -> (i32, i32) {
    %c0_i32 = arith.constant 0 : i32
    %c0_i32_0 = arith.constant 0 : i32
    return %arg0, %c0_i32 : i32, i32
  }
}

</mosaic_0001>

<bundles_post_ra>
// kernel: cproxy_forward.1
= control target key start
LH: loop header
LB: loop body
LE: loop exit
PB: predicated region body
PF: predicated region fallthrough
CT: control target
= control target key end

     0   :  { %v255_v0 = vmov 0.0   ;;  %vm256_vm0 = vmmov 0   ;;  %s318_s1 = inlined_call_operand.vmem [shape: bf16[128,128], index: 1, kind: input, shape index: {}]   ;;  %s319_s0 = inlined_call_operand.vmem [shape: bf16[16,128], index: 0, kind: input, shape index: {}]   ;;  %s320_s2 = inlined_call_operand.vmem [shape: f32[1,128], index: 2, kind: input, shape index: {}]   ;;  %s321_s3 = inlined_call_operand.vmem [shape: f32[1,128], index: 3, kind: input, shape index: {}]   ;;  %s322_s4 = inlined_call_operand.vmem [shape: bf16[16,128], index: 4, kind: output, shape index: {}]  }
   0x1   :  { %216 = vmatprep.subr.bf16.mxu0 %v255_v0  ;;  %v238_v1 = vld [vmem:[%s318_s1] sm:$0xff]   ;;  %232 = vmatprep.mubr.msk.bf16.mxu0 %vm256_vm0, %v255_v0  ;;  %v239_v2 = vld [vmem:[%s318_s1 + $0x8] sm:$0xff]   ;;  %v240_v3 = vld [vmem:[%s318_s1 + $0x10] sm:$0xff]  }
   0x2   :  { %217 = vmatpush3.bf16.msra.mxu0 %v238_v1  ;;  %v241_v4 = vld [vmem:[%s318_s1 + $0x18] sm:$0xff]   ;;  %v242_v5 = vld [vmem:[%s318_s1 + $0x20] sm:$0xff]   ;;  %v243_v6 = vld [vmem:[%s318_s1 + $0x28] sm:$0xff]  }
   0x3   :  { %218 = vmatprep.subr.bf16.mxu0 %v255_v0  ;;  %v244_v7 = vld [vmem:[%s318_s1 + $0x30] sm:$0xff]   ;;  %v245_v8 = vld [vmem:[%s318_s1 + $0x38] sm:$0xff]   ;;  %v246_v9 = vld [vmem:[%s319_s0] sm:$0xff]  }
   0x4   :  { %v196_v10 = vld [vmem:[%s320_s2] ss:$0 sm:$0xff] }
   0x5   :  { %v197_v12 = vld [vmem:[%s321_s3] ss:$0 sm:$0xff] }
   0x6   :  { %219 = vmatpush3.bf16.msra.mxu0 %v239_v2 }
   0x7   :  { %220 = vmatprep.subr.bf16.mxu0 %v255_v0 }
   0xa   :  { %221 = vmatpush3.bf16.msra.mxu0 %v240_v3 }
   0xb   :  { %222 = vmatprep.subr.bf16.mxu0 %v255_v0 }
   0xe   :  { %223 = vmatpush3.bf16.msra.mxu0 %v241_v4 }
   0xf   :  { %224 = vmatprep.subr.bf16.mxu0 %v255_v0 }
  0x12   :  { %225 = vmatpush3.bf16.msra.mxu0 %v242_v5 }
  0x13   :  { %226 = vmatprep.subr.bf16.mxu0 %v255_v0 }
  0x16   :  { %227 = vmatpush3.bf16.msra.mxu0 %v243_v6 }
  0x17   :  { %228 = vmatprep.subr.bf16.mxu0 %v255_v0 }
  0x1a   :  { %229 = vmatpush3.bf16.msra.mxu0 %v244_v7 }
  0x1b   :  { %230 = vmatprep.subr.bf16.mxu0 %v255_v0 }
  0x1e   :  { %231 = vmatpush3.bf16.msra.mxu0 %v245_v8 }
  0x21   :  { %233 = vmatmul.mubr.bf16.vlgmr.msra.gmra.mrb[0].mxu0 %v246_v9 }
  0xf4   :  { %v124_v11 = vpop.f32.mrb[0].mxu0 }
  0xf5   :  { %v138_v13 = vmul.f32 %v196_v10, %v124_v11  ;;  %v234_v14 = vpop.f32.mrb[1].mxu0 }
  0xf6   :  { %v127_v15 = vpop.f32.mrb[2].mxu0 }
  0xf7   :  { %v139_v16 = vmul.f32 %v196_v10, %v127_v15  ;;  %v235_v17 = vpop.f32.mrb[3].mxu0  ;;  %v147_v18 = vadd.f32 %v197_v12, %v138_v13 }
  0xf9   :  { %149 = vmax.xlane.f32.xlu0 %v147_v18  ;;  %v148_v19 = vadd.f32 %v197_v12, %v139_v16 }
  0xfd   :  { %151 = vmax.xlane.f32.xlu0 %v148_v19 }
 0x186   :  { %v150_v20 = vpop.xlane.xlu0 %149 }
 0x187   :  { %v153_v21 = vsub.f32 %v147_v18, %v150_v20 }
 0x189   :  { %v155_v22 = vmul.f32 1.442695, %v153_v21 }
 0x18a   :  { %v152_v23 = vpop.xlane.xlu0 %151 }
 0x18b   :  { %247 = vpow2.f32 %v155_v22  ;;  %v154_v24 = vsub.f32 %v148_v19, %v152_v23 }
 0x18d   :  { %v157_v25 = vmul.f32 1.442695, %v154_v24 }
 0x18f   :  { %249 = vpow2.f32 %v157_v25 }
 0x195   :  { %v248_v26 = vpop.eup %247 }
 0x196   :  { %159 = vadd.xlane.f32.xlu1 %v248_v26 }
 0x199   :  { %v250_v27 = vpop.eup %249 }
 0x19a   :  { %161 = vadd.xlane.f32.xlu1 %v250_v27 }
 0x223   :  { %v160_v28 = vpop.xlane.xlu1 %159 }
 0x224   :  { %251 = vrcp.f32 %v160_v28 }
 0x227   :  { %v162_v29 = vpop.xlane.xlu1 %161 }
 0x228   :  { %253 = vrcp.f32 %v162_v29 }
 0x22e   :  { %v252_v30 = vpop.eup %251 }
 0x22f   :  { %v165_v31 = vmul.f32 %v252_v30, %v160_v28 }
 0x231   :  { %v167_v32 = vsub.f32 2.0, %v165_v31 }
 0x232   :  { %v254_v33 = vpop.eup %253 }
 0x233   :  { %v166_v34 = vmul.f32 %v254_v33, %v162_v29  ;;  %v169_v35 = vmul.f32 %v252_v30, %v167_v32 }
 0x235   :  { %v168_v36 = vsub.f32 2.0, %v166_v34  ;;  %v171_v38 = vmul.f32 %v248_v26, %v169_v35 }
 0x237   :  { %v170_v37 = vmul.f32 %v254_v33, %v168_v36 }
 0x239   :  { %v172_v39 = vmul.f32 %v250_v27, %v170_v37 }
 0x23b   :  { %v205_v40 = vpack.c.bf16 %v172_v39, %v171_v38 }
 0x23d   :  { %206 = vst [vmem:[%s322_s4] sm:$0xff] %v205_v40  }

</bundles_post_ra>
